<compile_context>
chip_gen: v6e
topology: v6e:2x2x1
jax: 0.10.0
libtpu: 0.0.40
codegen_flags: <defaults>
</compile_context>

<pallas_src>
import functools

import jax
import jax.numpy as jnp
from jax import lax
from jax.experimental import pallas as pl
from jax.experimental.pallas import tpu as pltpu


def _round_up(n, m):
    return ((n + m - 1) // m) * m


def _vmem_cap_bytes():
    """Physical VMEM per core minus headroom for Mosaic internal scratch."""
    try:
        cap = int(pltpu.get_tpu_info().vmem_capacity_bytes)
    except Exception:
        cap = 64 * 1024 * 1024  # conservative (v7x-sized) fallback
    return cap - max(cap // 8, 8 * 1024 * 1024)


def _autoencoder_kernel(x_ref, w1_ref, b1_ref, w2_ref, b2_ref, out_ref,
                        *, h_chunk, n_chunks):
    x = x_ref[...]
    d_out = out_ref.shape[-1]

    def chunk_body(c, acc):
        off = pl.multiple_of(c * h_chunk, 128)
        # Encoder slice: x @ W1[:, off:off+h_chunk]  (MXU, bf16 in / f32 acc)
        h = jnp.dot(x, w1_ref[:, pl.ds(off, h_chunk)],
                    preferred_element_type=jnp.float32)
        # Bias + ReLU on the VPU (overlaps with the next chunk's MXU work).
        h = jnp.maximum(h + b1_ref[:, pl.ds(off, h_chunk)], 0.0)
        # Decoder slice: accumulate ReLU(h) @ W2[off:off+h_chunk, :] in f32.
        return acc + jnp.dot(h.astype(w2_ref.dtype),
                             w2_ref[pl.ds(off, h_chunk), :],
                             preferred_element_type=jnp.float32)

    acc = jnp.zeros((x.shape[0], d_out), jnp.float32)
    acc = lax.fori_loop(0, n_chunks, chunk_body, acc, unroll=True)
    out_ref[...] = (acc + b2_ref[...]).astype(out_ref.dtype)


def prepare_params(w1, b1, w2, b2, *, compute_dtype=jnp.bfloat16):
    """Pad/cast the weights ONCE (hoisted out of the per-call hot path).

    w1: (D, H), b1: (1, H), w2: (H, D), b2: (1, D).
    Zero padding is mathematically inert: padded hidden units have zero weight
    and zero bias -> ReLU(0) = 0 -> contribute nothing downstream.
    """
    D, H = w1.shape
    D_pad = _round_up(D, 128)
    H_pad = _round_up(H, 128)
    w1_p = jnp.zeros((D_pad, H_pad), compute_dtype).at[:D, :H].set(
        w1.astype(compute_dtype))
    b1_p = jnp.zeros((1, H_pad), jnp.float32).at[:, :H].set(
        b1.astype(jnp.float32))
    w2_p = jnp.zeros((H_pad, D_pad), compute_dtype).at[:H, :D].set(
        w2.astype(compute_dtype))
    b2_p = jnp.zeros((1, D_pad), jnp.float32).at[:, :D].set(
        b2.astype(jnp.float32))
    return dict(w1=w1_p, b1=b1_p, w2=w2_p, b2=b2_p, D=D, H=H)


def autoencoder_forward(x, params, *, block_batch=512, out_dtype=None):
    """x: (B, D) float; params: output of prepare_params."""
    B, D = x.shape
    assert D == params["D"], "input feature dim mismatch"
    w1_p, b1_p, w2_p, b2_p = params["w1"], params["b1"], params["w2"], params["b2"]
    D_pad, H_pad = w1_p.shape
    compute_dtype = w1_p.dtype
    itemsize = jnp.dtype(compute_dtype).itemsize
    out_dtype = jnp.dtype(out_dtype) if out_dtype is not None else x.dtype
    out_itemsize = jnp.dtype(out_dtype).itemsize

    # Hidden-dim chunk: largest of {512, 256, 128} dividing H_pad (all ok, H_pad%128==0).
    if H_pad <= 512:
        h_chunk = H_pad
    elif H_pad % 512 == 0:
        h_chunk = 512
    elif H_pad % 256 == 0:
        h_chunk = 256
    else:
        h_chunk = 128
    n_chunks = H_pad // h_chunk

    vmem_cap = _vmem_cap_bytes()

    def vmem_need(tb):
        return (
            2 * tb * D_pad * itemsize            # x tile, double-buffered
            + 2 * tb * D_pad * out_itemsize      # out tile, double-buffered
            + D_pad * H_pad * itemsize           # w1, single-buffered
            + H_pad * D_pad * itemsize           # w2, single-buffered
            + (H_pad + D_pad) * 4                # biases, single-buffered
            + tb * h_chunk * 4                   # f32 hidden chunk
            + tb * h_chunk * itemsize            # hidden chunk cast to bf16
            + tb * D_pad * 4                     # f32 accumulator
        )

    # Adaptive batch tile: over-pad by at most one tile, shrink if VMEM-tight.
    B8 = _round_up(B, 8)
    n_tiles = max(1, -(-B8 // max(block_batch, 8)))
    TB = _round_up(-(-B8 // n_tiles), 8)
    while TB > 8 and vmem_need(TB) > vmem_cap:
        TB = _round_up(TB // 2, 8)
    B_pad = _round_up(B8, TB)

    # Only materialize a padded copy of x if the shape actually requires it.
    if (B_pad, D_pad) != (B, D):
        x_p = jnp.zeros((B_pad, D_pad), compute_dtype).at[:B, :D].set(
            x.astype(compute_dtype))
    else:
        x_p = x.astype(compute_dtype)

    grid = (B_pad // TB,)
    vmem_limit = int(min(max(int(1.25 * vmem_need(TB)), 8 * 1024 * 1024),
                         vmem_cap))

    flops = 2 * B_pad * D_pad * H_pad * 2  # two matmuls
    bytes_accessed = (B_pad * D_pad * itemsize                 # x read
                      + D_pad * H_pad * itemsize * 2           # w1 + w2
                      + (H_pad + D_pad) * 4                    # biases
                      + B_pad * D_pad * out_itemsize)          # out write

    kernel = functools.partial(_autoencoder_kernel,
                               h_chunk=h_chunk, n_chunks=n_chunks)

    out_p = pl.pallas_call(
        kernel,
        out_shape=jax.ShapeDtypeStruct((B_pad, D_pad), out_dtype),
        grid_spec=pltpu.PrefetchScalarGridSpec(
            num_scalar_prefetch=0,
            grid=grid,
            in_specs=[
                # x streams tile-by-tile (double-buffered by default).
                pl.BlockSpec((TB, D_pad), lambda i: (i, 0)),
                # Weights/biases: constant index_map (DMA'd once, revisited free)
                # and single-buffered -> half the resident VMEM.
                pl.BlockSpec((D_pad, H_pad), lambda i: (0, 0),
                             pipeline_mode=pl.Buffered(1)),
                pl.BlockSpec((1, H_pad), lambda i: (0, 0),
                             pipeline_mode=pl.Buffered(1)),
                pl.BlockSpec((H_pad, D_pad), lambda i: (0, 0),
                             pipeline_mode=pl.Buffered(1)),
                pl.BlockSpec((1, D_pad), lambda i: (0, 0),
                             pipeline_mode=pl.Buffered(1)),
            ],
            out_specs=pl.BlockSpec((TB, D_pad), lambda i: (i, 0)),  # lane-dense
        ),
        compiler_params=pltpu.CompilerParams(
            dimension_semantics=("parallel",),
            vmem_limit_bytes=vmem_limit,
        ),
        cost_estimate=pl.CostEstimate(
            flops=flops, transcendentals=0, bytes_accessed=bytes_accessed),
    )(x_p, w1_p, b1_p, w2_p, b2_p)

    if (B_pad, D_pad) != (B, D):
        out_p = out_p[:B, :D]
    return out_p


def init_params(key, input_dim, hidden_dim):
    """Deterministic init mimicking nn.Linear's uniform(-1/sqrt(fan_in), 1/sqrt(fan_in))."""
    k1, k2, k3, k4 = jax.random.split(key, 4)
    bound1 = 1.0 / jnp.sqrt(input_dim)
    bound2 = 1.0 / jnp.sqrt(hidden_dim)
    w1 = jax.random.uniform(k1, (input_dim, hidden_dim), jnp.float32, -bound1, bound1)
    b1 = jax.random.uniform(k2, (1, hidden_dim), jnp.float32, -bound1, bound1)
    w2 = jax.random.uniform(k3, (hidden_dim, input_dim), jnp.float32, -bound2, bound2)
    b2 = jax.random.uniform(k4, (1, input_dim), jnp.float32, -bound2, bound2)
    return w1, b1, w2, b2


if __name__ == "__main__":
    batch = 8
    input_dim = 16
    hidden_dim = 32

    key = jax.random.PRNGKey(0)
    kx, kp = jax.random.split(key)
    x = jax.random.normal(kx, (batch, input_dim), jnp.float32)
    w1, b1, w2, b2 = init_params(kp, input_dim, hidden_dim)

    params = prepare_params(w1, b1, w2, b2)          # padded/cast once (hoisted)
    out = autoencoder_forward(x, params, out_dtype=jnp.float32)
    jax.block_until_ready(out)

    # Reference 1: same bf16-rounded matmul inputs as the kernel (tight check).
    xb = x.astype(jnp.bfloat16).astype(jnp.float32)
    w1b = w1.astype(jnp.bfloat16).astype(jnp.float32)
    w2b = w2.astype(jnp.bfloat16).astype(jnp.float32)
    hb = jnp.maximum(xb @ w1b + b1, 0.0)
    ref_bf16 = hb.astype(jnp.bfloat16).astype(jnp.float32) @ w2b + b2

    # Reference 2: full-precision PyTorch-equivalent math (loose check).
    ref_f32 = jnp.maximum(x @ w1 + b1, 0.0) @ w2 + b2

    assert out.shape == (batch, input_dim)
    assert jnp.allclose(out, ref_bf16, atol=1e-4, rtol=1e-4), (
        float(jnp.max(jnp.abs(out - ref_bf16))))
    assert jnp.allclose(out, ref_f32, atol=5e-2, rtol=5e-2), (
        float(jnp.max(jnp.abs(out - ref_f32))))

    print("KERNEL_OK")
</pallas_src>

<mosaic_0001>
module attributes {stable_mosaic.version = 11 : i64} {
  func.func @_autoencoder_kernel(%arg0: i32, %arg1: memref<8x128xbf16, #tpu.memory_space<vmem>>, %arg2: memref<128x128xbf16, #tpu.memory_space<vmem>>, %arg3: memref<1x128xf32, #tpu.memory_space<vmem>>, %arg4: memref<128x128xbf16, #tpu.memory_space<vmem>>, %arg5: memref<1x128xf32, #tpu.memory_space<vmem>>, %arg6: memref<8x128xf32, #tpu.memory_space<vmem>>) attributes {dimension_semantics = [#tpu.dimension_semantics<parallel>], iteration_bounds = array<i64: 1>, scalar_prefetch = 0 : i64, scratch_operands = 0 : i64, tpu.core_type = #tpu.core_type<tc>, window_params = [{transform_indices = @transform_0, window_bounds = array<i64: 8, 128>}, {pipeline_mode = #tpu.pipeline_mode<synchronous>, transform_indices = @transform_1, window_bounds = array<i64: 128, 128>}, {pipeline_mode = #tpu.pipeline_mode<synchronous>, transform_indices = @transform_2, window_bounds = array<i64: 1, 128>}, {pipeline_mode = #tpu.pipeline_mode<synchronous>, transform_indices = @transform_3, window_bounds = array<i64: 128, 128>}, {pipeline_mode = #tpu.pipeline_mode<synchronous>, transform_indices = @transform_4, window_bounds = array<i64: 1, 128>}, {transform_indices = @transform_5, window_bounds = array<i64: 8, 128>}]} {
    %c0 = arith.constant 0 : index
    %c0_0 = arith.constant 0 : index
    %0 = vector.load %arg1[%c0, %c0_0] : memref<8x128xbf16, #tpu.memory_space<vmem>>, vector<8x128xbf16>
    %cst = arith.constant 0.000000e+00 : f32
    %1 = vector.broadcast %cst : f32 to vector<8x128xf32>
    %c0_i32 = arith.constant 0 : i32
    %c128_i32 = arith.constant 128 : i32
    %2 = arith.muli %c0_i32, %c128_i32 : i32
    %3 = tpu.assume_multiple %2, 128 : i32
    %c0_1 = arith.constant 0 : index
    %4 = arith.index_cast %3 : i32 to index
    %5 = vector.load %arg2[%c0_1, %4] : memref<128x128xbf16, #tpu.memory_space<vmem>>, vector<128x128xbf16>
    %cst_2 = arith.constant dense<0.000000e+00> : vector<8x128xf32>
    %6 = tpu.matmul %0, %5, %cst_2 {dimension_numbers = #tpu.dot_dimension_numbers<[1], [0], [0], [1], [0, 0, 1, 1], [], []>} : vector<8x128xbf16>, vector<128x128xbf16>, vector<8x128xf32> -> vector<8x128xf32>
    %c0_3 = arith.constant 0 : index
    %7 = arith.index_cast %3 : i32 to index
    %8 = vector.load %arg3[%c0_3, %7] : memref<1x128xf32, #tpu.memory_space<vmem>>, vector<1x128xf32>
    %9 = vector.broadcast %8 : vector<1x128xf32> to vector<8x128xf32>
    %10 = arith.addf %6, %9 : vector<8x128xf32>
    %cst_4 = arith.constant 0.000000e+00 : f32
    %11 = vector.broadcast %cst_4 : f32 to vector<8x128xf32>
    %12 = arith.maximumf %10, %11 : vector<8x128xf32>
    %13 = arith.truncf %12 : vector<8x128xf32> to vector<8x128xbf16>
    %14 = arith.index_cast %3 : i32 to index
    %c0_5 = arith.constant 0 : index
    %15 = vector.load %arg4[%14, %c0_5] : memref<128x128xbf16, #tpu.memory_space<vmem>>, vector<128x128xbf16>
    %cst_6 = arith.constant dense<0.000000e+00> : vector<8x128xf32>
    %16 = tpu.matmul %13, %15, %cst_6 {dimension_numbers = #tpu.dot_dimension_numbers<[1], [0], [0], [1], [0, 0, 1, 1], [], []>} : vector<8x128xbf16>, vector<128x128xbf16>, vector<8x128xf32> -> vector<8x128xf32>
    %17 = arith.addf %1, %16 : vector<8x128xf32>
    %c1_i32 = arith.constant 1 : i32
    %c0_7 = arith.constant 0 : index
    %c0_8 = arith.constant 0 : index
    %18 = vector.load %arg5[%c0_7, %c0_8] : memref<1x128xf32, #tpu.memory_space<vmem>>, vector<1x128xf32>
    %19 = vector.broadcast %18 : vector<1x128xf32> to vector<8x128xf32>
    %20 = arith.addf %17, %19 : vector<8x128xf32>
    %c0_9 = arith.constant 0 : index
    %c0_10 = arith.constant 0 : index
    %21 = vector.load %arg6[%c0_9, %c0_10] : memref<8x128xf32, #tpu.memory_space<vmem>>, vector<8x128xf32>
    tpu.vector_store %arg6[%c0_9, %c0_10], %20 {strides = array<i32>} : memref<8x128xf32, #tpu.memory_space<vmem>>, vector<8x128xf32>,
    return
  }
  func.func @transform_0(%arg0: i32) -> (i32, i32) {
    %c0_i32 = arith.constant 0 : i32
    %c0_i32_0 = arith.constant 0 : i32
    return %arg0, %c0_i32 : i32, i32
  }
  func.func @transform_1(%arg0: i32) -> (i32, i32) {
    %c0_i32 = arith.constant 0 : i32
    %c0_i32_0 = arith.constant 0 : i32
    %c0_i32_1 = arith.constant 0 : i32
    return %c0_i32, %c0_i32_0 : i32, i32
  }
  func.func @transform_2(%arg0: i32) -> (i32, i32) {
    %c0_i32 = arith.constant 0 : i32
    %c0_i32_0 = arith.constant 0 : i32
    %c0_i32_1 = arith.constant 0 : i32
    return %c0_i32, %c0_i32_0 : i32, i32
  }
  func.func @transform_3(%arg0: i32) -> (i32, i32) {
    %c0_i32 = arith.constant 0 : i32
    %c0_i32_0 = arith.constant 0 : i32
    %c0_i32_1 = arith.constant 0 : i32
    return %c0_i32, %c0_i32_0 : i32, i32
  }
  func.func @transform_4(%arg0: i32) -> (i32, i32) {
    %c0_i32 = arith.constant 0 : i32
    %c0_i32_0 = arith.constant 0 : i32
    %c0_i32_1 = arith.constant 0 : i32
    return %c0_i32, %c0_i32_0 : i32, i32
  }
  func.func @transform_5(%arg0: i32) -> (i32, i32) {
    %c0_i32 = arith.constant 0 : i32
    %c0_i32_0 = arith.constant 0 : i32
    return %arg0, %c0_i32 : i32, i32
  }
}

</mosaic_0001>

<bundles_post_ra>
// kernel: tpu_custom_call.1
= control target key start
LH: loop header
LB: loop body
LE: loop exit
PB: predicated region body
PF: predicated region fallthrough
CT: control target
= control target key end

     0   :  { %10 = vsyncpa [#allocation3], 0  ;;  %s545_s0 = inlined_call_operand.hbm [shape: bf16[8,128], index: 0, kind: input, shape index: {}]   ;;  %s546_s1 = inlined_call_operand.hbm [shape: bf16[128,128], index: 1, kind: input, shape index: {}]   ;;  %s547_s2 = inlined_call_operand.vmem [shape: f32[1,128], index: 2, kind: input, shape index: {}]   ;;  %s548_s3 = inlined_call_operand.hbm [shape: bf16[128,128], index: 3, kind: input, shape index: {}]   ;;  %s549_s4 = inlined_call_operand.vmem [shape: f32[1,128], index: 4, kind: input, shape index: {}]   ;;  %s550_s5 = inlined_call_operand.hbm [shape: f32[8,128], index: 5, kind: output, shape index: {}]  }
   0x1   :  { %11 = vsyncpa [#allocation6], 0 }
   0x2   :  { %12 = vsyncpa [#allocation4], 0  ;;  %s489_s18 = smov [#allocation5]  }
   0x3   :  { %s28_s19 = sshll.u32 %s489_s18, 4  ;;  %s29_s19 = int_to_ptr.vmem [resolvable:$true] %s28_s19 }
   0x4   :  { %s411_s20 = scalar_lea.vmem %s29_s19, 1024  ;;  %p416_p1 = scmp.lt.s32.totalorder %s29_s19, %s29_s19 }
   0x5   :  { %p412_p0 = scmp.ne.s32.totalorder %s29_s19, %s411_s20  ;;  %p417_p2 = scmp.lt.s32.totalorder %s411_s20, %s411_s20 }
   0x7   :  { %p418_p3 = por %p417_p2, %p416_p1 }
   0x9   :  { %p419_p4 = pnand %p418_p3, %p412_p0 }
   0xb   :  { %422 = shalt.err (!%p419_p4)
}
   0xc   :  { %s490_s21 = smov 64   ;;  %s491_s22 = smov 4  }
   0xd   :  { %34 = dma.hbm_to_vmem [thread:$0]  %s546_s1, 1024, %s29_s19, [#allocation6], %s490_s21, %s490_s21, %s491_s22  }
   0xe   :  { %s492_s25 = smov [#allocation2]   ;;  %s493_s27 = smov [#allocation7]  }
   0xf   :  { %s19_s26 = sshll.u32 %s492_s25, 4  ;;  %s42_s28 = sshll.u32 %s493_s27, 4  ;;  %s20_s26 = int_to_ptr.vmem [resolvable:$true] %s19_s26  ;;  %s43_s28 = int_to_ptr.vmem [resolvable:$true] %s42_s28 }
  0x10   :  { %s431_s29 = scalar_lea.vmem %s20_s26, 64  ;;  %p436_p6 = scmp.lt.s32.totalorder %s20_s26, %s20_s26 }
  0x11   :  { %p432_p5 = scmp.ne.s32.totalorder %s20_s26, %s431_s29  ;;  %p437_p7 = scmp.lt.s32.totalorder %s431_s29, %s431_s29 }
  0x13   :  { %p438_p8 = por %p437_p7, %p436_p6 }
  0x15   :  { %p439_p9 = pnand %p438_p8, %p432_p5 }
  0x17   :  { %442 = shalt.err (!%p439_p9)
}
  0x18   :  { %22 = dma.hbm_to_vmem [thread:$0]  %s545_s0, 64, %s20_s26, [#allocation3]  }
  0x19   :  { %s451_s7 = scalar_lea.vmem %s43_s28, 1024  ;;  %p456_p11 = scmp.lt.s32.totalorder %s43_s28, %s43_s28 }
  0x1a   :  { %p452_p10 = scmp.ne.s32.totalorder %s43_s28, %s451_s7  ;;  %p457_p12 = scmp.lt.s32.totalorder %s451_s7, %s451_s7 }
  0x1c   :  { %p458_p13 = por %p457_p12, %p456_p11 }
  0x1e   :  { %p459_p0 = pnand %p458_p13, %p452_p10 }
  0x20   :  { %462 = shalt.err (!%p459_p0)
}
  0x21   :  { %48 = dma.hbm_to_vmem [thread:$0]  %s548_s3, 1024, %s43_s28, [#allocation6], %s490_s21, %s490_s21, %s491_s22  }
  0x22   :  { %483 = dma.done.wait [#allocation3], 64  }
  0x23   :  { %484 = vsyncadd [#allocation3], 4294967232 }
  0x24   :  { %485 = dma.done.wait [#allocation6], 2048  }
  0x25   :  { %486 = vsyncadd [#allocation6], 4294965248  ;;  %v494_v0 = vmov 0.0   ;;  %vm495_vm0 = vmmov 0   ;;  %v387_v1 = vld [vmem:[#allocation5 + $0x38] sm:$0xff]   ;;  %v388_v2 = vld [vmem:[#allocation5 + $0x30] sm:$0xff]  }
  0x26   :  { %339 = vmatprep.subr.bf16.mxu0 %v494_v0  ;;  %355 = vmatprep.mubr.msk.bf16.mxu0 %vm495_vm0, %v494_v0  ;;  %v389_v3 = vld [vmem:[#allocation5 + $0x28] sm:$0xff]   ;;  %v395_v4 = vld [vmem:[#allocation7 + $0x38] sm:$0xff]   ;;  %v390_v5 = vld [vmem:[#allocation5 + $0x20] sm:$0xff]   ;;  %s496_s11 = smov [#allocation8]  }
  0x27   :  { %359 = vmatprep.subr.bf16.mxu1 %v494_v0  ;;  %375 = vmatprep.mubr.msk.bf16.mxu1 %vm495_vm0, %v494_v0  ;;  %v396_v6 = vld [vmem:[#allocation7 + $0x30] sm:$0xff]   ;;  %v391_v7 = vld [vmem:[#allocation5 + $0x18] sm:$0xff]   ;;  %v397_v8 = vld [vmem:[#allocation7 + $0x28] sm:$0xff]   ;;  %s293_s12 = sshll.u32 %s496_s11, 4  ;;  %s294_s12 = int_to_ptr.vmem [resolvable:$true] %s293_s12 }
  0x28   :  { %340 = vmatpush3.bf16.msra.mxu0 %v387_v1  ;;  %360 = vmatpush3.bf16.msra.mxu1 %v395_v4  ;;  %v392_v9 = vld [vmem:[#allocation5 + $0x10] sm:$0xff]   ;;  %v398_v10 = vld [vmem:[#allocation7 + $0x20] sm:$0xff]   ;;  %v393_v11 = vld [vmem:[#allocation5 + $0x8] sm:$0xff]   ;;  %p468_p2 = scmp.lt.s32.totalorder %s294_s12, %s294_s12 }
  0x29   :  { %341 = vmatprep.subr.bf16.mxu0 %v494_v0  ;;  %361 = vmatprep.subr.bf16.mxu1 %v494_v0  ;;  %v399_v12 = vld [vmem:[#allocation7 + $0x18] sm:$0xff]   ;;  %v394_v13 = vld [vmem:[#allocation5] sm:$0xff]   ;;  %v400_v14 = vld [vmem:[#allocation7 + $0x10] sm:$0xff]  }
  0x2a   :  { %v61_v15 = vld [vmem:[#allocation2] sm:$0xf]  ;;  %v401_v16 = vld [vmem:[#allocation7 + $0x8] sm:$0xff]   ;;  %v402_v17 = vld [vmem:[#allocation7] sm:$0xff]  }
  0x2b   :  { %v303_v18 = vld [vmem:[%s547_s2] ss:$0 sm:$0xff]  ;;  %s463_s2 = scalar_lea.vmem %s294_s12, 128 }
  0x2c   :  { %342 = vmatpush3.bf16.msra.mxu0 %v388_v2  ;;  %362 = vmatpush3.bf16.msra.mxu1 %v396_v6  ;;  %v312_v26 = vld [vmem:[%s549_s4] ss:$0 sm:$0xff]  ;;  %p464_p1 = scmp.ne.s32.totalorder %s294_s12, %s463_s2  ;;  %p469_p3 = scmp.lt.s32.totalorder %s463_s2, %s463_s2 }
  0x2d   :  { %343 = vmatprep.subr.bf16.mxu0 %v494_v0  ;;  %363 = vmatprep.subr.bf16.mxu1 %v494_v0 }
  0x2e   :  { %p470_p4 = por %p469_p3, %p468_p2 }
  0x30   :  { %344 = vmatpush3.bf16.msra.mxu0 %v389_v3  ;;  %364 = vmatpush3.bf16.msra.mxu1 %v397_v8  ;;  %p471_p5 = pnand %p470_p4, %p464_p1 }
  0x31   :  { %345 = vmatprep.subr.bf16.mxu0 %v494_v0  ;;  %365 = vmatprep.subr.bf16.mxu1 %v494_v0 }
  0x34   :  { %346 = vmatpush3.bf16.msra.mxu0 %v390_v5  ;;  %366 = vmatpush3.bf16.msra.mxu1 %v398_v10 }
  0x35   :  { %347 = vmatprep.subr.bf16.mxu0 %v494_v0  ;;  %367 = vmatprep.subr.bf16.mxu1 %v494_v0 }
  0x38   :  { %348 = vmatpush3.bf16.msra.mxu0 %v391_v7  ;;  %368 = vmatpush3.bf16.msra.mxu1 %v399_v12 }
  0x39   :  { %349 = vmatprep.subr.bf16.mxu0 %v494_v0  ;;  %369 = vmatprep.subr.bf16.mxu1 %v494_v0 }
  0x3c   :  { %350 = vmatpush3.bf16.msra.mxu0 %v392_v9  ;;  %370 = vmatpush3.bf16.msra.mxu1 %v400_v14 }
  0x3d   :  { %351 = vmatprep.subr.bf16.mxu0 %v494_v0  ;;  %371 = vmatprep.subr.bf16.mxu1 %v494_v0 }
  0x40   :  { %352 = vmatpush3.bf16.msra.mxu0 %v393_v11  ;;  %372 = vmatpush3.bf16.msra.mxu1 %v401_v16 }
  0x41   :  { %353 = vmatprep.subr.bf16.mxu0 %v494_v0  ;;  %373 = vmatprep.subr.bf16.mxu1 %v494_v0 }
  0x44   :  { %354 = vmatpush3.bf16.msra.mxu0 %v394_v13  ;;  %374 = vmatpush3.bf16.msra.mxu1 %v402_v17 }
  0x47   :  { %356 = vmatmul.mubr.bf16.vlgmr.msra.gmra.mxu0 %v61_v15 }
 0x107   :  { %v167_v19 = vpop.f32.mrf.mxu0 }
 0x108   :  { %v168_v20 = vadd.f32 %v303_v18, %v167_v19 }
 0x109   :  { %v357_v21 = vpop.f32.mrf.mxu0 }
 0x10a   :  { %v173_v22 = vmax.f32 %v168_v20, 0.0 }
 0x10b   :  { %v170_v23 = vpop.f32.mrf.mxu0 }
 0x10c   :  { %v174_v24 = vpack.c.bf16 %v173_v22, %v173_v22 }
 0x10d   :  { %v358_v25 = vpop.f32.mrf.mxu0 }
 0x10e   :  { %376 = vmatmul.mubr.bf16.vlgmr.msra.gmra.mxu1 %v174_v24 }
 0x1ce   :  { %v280_v27 = vpop.f32.mrf.mxu1 }
 0x1cf   :  { %v281_v28 = vadd.f32 %v312_v26, %v280_v27 }
 0x1d0   :  { %v377_v29 = vpop.f32.mrf.mxu1 }
 0x1d1   :  { %286 = vst [vmem:[#allocation8] sm:$0xff] %v281_v28 }
 0x1d2   :  { %v283_v30 = vpop.f32.mrf.mxu1 }
 0x1d3   :  { %474 = shalt.err (!%p471_p5)
}
 0x1d4   :  { %296 = dma.vmem_to_hbm [thread:$0]  %s294_s12, 128, %s550_s5, [#allocation4]   ;;  %v378_v31 = vpop.f32.mrf.mxu1 }
 0x1d5   :  { %487 = dma.done.wait [#allocation4], 128  }
 0x1d6   :  { %488 = vsyncadd [#allocation4], 4294967168 }
 0x1d7   :  { %300 = vsyncpa [#allocation3], 1 }
 0x1d8   :  { %301 = vsyncpa [#allocation6], 1 }
 0x1d9   :  { %302 = vsyncpa [#allocation4], 1 }

</bundles_post_ra>
